<compile_context>
chip_gen: v7x
topology: tpu7x:2x2x1
jax: 0.10.0
libtpu: 0.0.40
codegen_flags: <defaults>
</compile_context>

<pallas_src>
import jax
import jax.numpy as jnp
from jax import lax
from jax.experimental import pallas as pl
from jax.experimental.pallas import tpu as pltpu

TEMPERATURE = 0.06
INV_TEMPERATURE = 1.0 / TEMPERATURE
EPS = 1e-6
NORM_EPS = 1e-12  # F.normalize default eps


def _pdc_loss_kernel(flag_ref, feat_ref, ids_col_ref, ids_row_ref, out_ref):
    B = feat_ref.shape[0]

    # ---- similarity matrix (computed before the early-return check, like the
    # reference): bf16 operands, f32 accumulation on the MXU ----------------
    feats = feat_ref[...].astype(jnp.float32)
    sq = jnp.sum(feats * feats, axis=1, keepdims=True)                 # (B, 1)
    inv_norm = lax.rsqrt(jnp.maximum(sq, jnp.float32(NORM_EPS * NORM_EPS)))
    rhs = (feats * inv_norm).astype(jnp.bfloat16)                      # normalized
    lhs = (feats * (inv_norm * jnp.float32(INV_TEMPERATURE))).astype(jnp.bfloat16)
    sim = lax.dot_general(
        lhs, rhs,
        dimension_numbers=(((1,), (1,)), ((), ())),
        preferred_element_type=jnp.float32,
    )                                                                  # (B, B) f32

    # ---- early-return default (reference returns 0.0) ---------------------
    out_ref[...] = jnp.zeros((1, 1), dtype=jnp.float32)

    # ---- softmax epilogue, only when positives AND negatives exist --------
    @pl.when(flag_ref[0] != 0)
    def _():
        # pairwise masks from the packed id tensors (VPU)
        lab_c = ids_col_ref[0]                                         # (B, 1)
        pat_c = ids_col_ref[1]
        dom_c = ids_col_ref[2]
        lab_r = ids_row_ref[0]                                         # (1, B)
        pat_r = ids_row_ref[1]
        dom_r = ids_row_ref[2]

        labels_equal = lab_c == lab_r                                  # (B, B)
        patient_diff = pat_c != pat_r
        domain_diff = dom_c != dom_r

        row_ids = lax.broadcasted_iota(jnp.int32, (B, B), 0)
        col_ids = lax.broadcasted_iota(jnp.int32, (B, B), 1)
        off_diag = row_ids != col_ids                                  # ~eye(B)

        positive_mask = labels_equal & (patient_diff | domain_diff) & off_diag
        # Kept verbatim from the reference (identically False).
        negative_mask = (~labels_equal) & (labels_equal & (~patient_diff)) & off_diag

        pos_f = positive_mask.astype(jnp.float32)
        neg_f = negative_mask.astype(jnp.float32)

        max_sim = jnp.max(sim, axis=1, keepdims=True)                  # (B, 1)
        exp_sim = jnp.exp(sim - max_sim)                               # (B, B)

        sum_pos = jnp.sum(exp_sim * pos_f, axis=1, keepdims=True)      # (B, 1)
        sum_neg = jnp.sum(exp_sim * neg_f, axis=1, keepdims=True)
        num_pos = jnp.maximum(jnp.sum(pos_f, axis=1, keepdims=True), jnp.float32(EPS))
        num_neg = jnp.maximum(jnp.sum(neg_f, axis=1, keepdims=True), jnp.float32(EPS))

        pos_sum = sum_pos * pl.reciprocal(num_pos, approx=True)
        neg_sum = sum_neg * pl.reciprocal(num_neg, approx=True)

        losses = -jnp.log(pos_sum * pl.reciprocal(neg_sum, approx=True)
                          + jnp.float32(EPS))                          # (B, 1)
        total = jnp.sum(losses, axis=0, keepdims=True) * jnp.float32(1.0 / B)
        out_ref[...] = total                                           # (1, 1)


def pdc_loss(features, labels, patient_ids, domain_ids):
    """features: [B, D] float; labels / patient_ids / domain_ids: [B] int."""
    B = features.shape[0]

    labels = labels.astype(jnp.int32)
    patient_ids = patient_ids.astype(jnp.int32)
    domain_ids = domain_ids.astype(jnp.int32)

    ids = jnp.stack([labels, patient_ids, domain_ids], axis=0)         # (3, B)
    ids_col = ids[:, :, None]                                          # (3, B, 1)
    ids_row = ids[:, None, :]                                          # (3, 1, B)

    # Early-return flag of the reference, as a tiny O(B^2) bool computation.
    # Passed as an SMEM scalar so the kernel's pl.when condition is a safe
    # scalar-memory read (no in-kernel vector->scalar extraction needed).
    lab_eq = labels[:, None] == labels[None, :]
    pat_diff = patient_ids[:, None] != patient_ids[None, :]
    dom_diff = domain_ids[:, None] != domain_ids[None, :]
    off_diag = ~jnp.eye(B, dtype=bool)
    pos_m = lab_eq & (pat_diff | dom_diff) & off_diag
    neg_m = (~lab_eq) & (lab_eq & (~pat_diff)) & off_diag
    flag = (jnp.any(pos_m) & jnp.any(neg_m)).astype(jnp.int32).reshape(1)

    smem = pl.BlockSpec(memory_space=pltpu.MemorySpace.SMEM)
    vmem = pl.BlockSpec(memory_space=pltpu.MemorySpace.VMEM)

    out = pl.pallas_call(
        _pdc_loss_kernel,
        out_shape=jax.ShapeDtypeStruct((1, 1), jnp.float32),
        in_specs=[smem, vmem, vmem, vmem],
        out_specs=vmem,
    )(flag, features, ids_col, ids_row)
    return out[0, 0]


if __name__ == "__main__":
    key = jax.random.PRNGKey(0)
    k1, k2, k3, k4 = jax.random.split(key, 4)

    B, D = 8, 32
    features = jax.random.normal(k1, (B, D), dtype=jnp.float32)
    labels = jax.random.randint(k2, (B,), 0, 2, dtype=jnp.int32)
    patient_ids = jax.random.randint(k3, (B,), 0, 4, dtype=jnp.int32)
    domain_ids = jax.random.randint(k4, (B,), 0, 2, dtype=jnp.int32)

    loss = pdc_loss(features, labels, patient_ids, domain_ids)
    jax.block_until_ready(loss)
    print("KERNEL_OK")
</pallas_src>

<mosaic_0001>
module attributes {stable_mosaic.version = 11 : i64} {
  func.func @_pdc_loss_kernel(%arg0: memref<1xi32, #tpu.memory_space<smem>>, %arg1: memref<8x32xf32, #tpu.memory_space<vmem>>, %arg2: memref<3x8x1xi32, #tpu.memory_space<vmem>>, %arg3: memref<3x1x8xi32, #tpu.memory_space<vmem>>, %arg4: memref<1x1xf32, #tpu.memory_space<vmem>>) attributes {dimension_semantics = [], scalar_prefetch = 0 : i64, scratch_operands = 0 : i64, tpu.core_type = #tpu.core_type<tc>} {
    %c0 = arith.constant 0 : index
    %c0_0 = arith.constant 0 : index
    %0 = vector.load %arg1[%c0, %c0_0] : memref<8x32xf32, #tpu.memory_space<vmem>>, vector<8x32xf32>
    %1 = arith.mulf %0, %0 : vector<8x32xf32>
    %cst = arith.constant dense<0.000000e+00> : vector<8xf32>
    %2 = vector.multi_reduction <add>, %1, %cst [1] : vector<8x32xf32> to vector<8xf32>
    %3 = vector.shape_cast %2 : vector<8xf32> to vector<8x1xf32>
    %cst_1 = arith.constant 1.000000e-24 : f32
    %4 = vector.broadcast %cst_1 : f32 to vector<8x1xf32>
    %5 = arith.maximumf %3, %4 : vector<8x1xf32>
    %6 = math.rsqrt %5 : vector<8x1xf32>
    %7 = vector.broadcast %6 : vector<8x1xf32> to vector<8x32xf32>
    %8 = arith.mulf %0, %7 : vector<8x32xf32>
    %9 = arith.truncf %8 : vector<8x32xf32> to vector<8x32xbf16>
    %cst_2 = arith.constant 16.666666 : f32
    %10 = vector.broadcast %cst_2 : f32 to vector<8x1xf32>
    %11 = arith.mulf %6, %10 : vector<8x1xf32>
    %12 = vector.broadcast %11 : vector<8x1xf32> to vector<8x32xf32>
    %13 = arith.mulf %0, %12 : vector<8x32xf32>
    %14 = arith.truncf %13 : vector<8x32xf32> to vector<8x32xbf16>
    %cst_3 = arith.constant dense<0.000000e+00> : vector<8x8xf32>
    %15 = tpu.matmul %14, %9, %cst_3 {dimension_numbers = #tpu.dot_dimension_numbers<[1], [1], [0], [0], [0, 0, 1, 0], [], []>} : vector<8x32xbf16>, vector<8x32xbf16>, vector<8x8xf32> -> vector<8x8xf32>
    %cst_4 = arith.constant 0.000000e+00 : f32
    %16 = vector.broadcast %cst_4 : f32 to vector<1x1xf32>
    %c0_5 = arith.constant 0 : index
    %c0_6 = arith.constant 0 : index
    %17 = vector.load %arg4[%c0_5, %c0_6] : memref<1x1xf32, #tpu.memory_space<vmem>>, vector<1x1xf32>
    tpu.vector_store %arg4[%c0_5, %c0_6], %16 {strides = array<i32>} : memref<1x1xf32, #tpu.memory_space<vmem>>, vector<1x1xf32>,
    %c0_7 = arith.constant 0 : index
    %18 = memref.load %arg0[%c0_7] : memref<1xi32, #tpu.memory_space<smem>>
    %c0_i32 = arith.constant 0 : i32
    %19 = arith.cmpi ne, %18, %c0_i32 : i32
    %20 = arith.extui %19 : i1 to i32
    %c0_i32_8 = arith.constant 0 : i32
    %21 = arith.cmpi ne, %20, %c0_i32_8 : i32
    scf.if %21 {
      %c0_9 = arith.constant 0 : index
      %c0_10 = arith.constant 0 : index
      %c0_11 = arith.constant 0 : index
      %22 = vector.load %arg2[%c0_9, %c0_10, %c0_11] : memref<3x8x1xi32, #tpu.memory_space<vmem>>, vector<1x8x1xi32>
      %23 = vector.shape_cast %22 : vector<1x8x1xi32> to vector<8x1xi32>
      %c1 = arith.constant 1 : index
      %c0_12 = arith.constant 0 : index
      %c0_13 = arith.constant 0 : index
      %24 = vector.load %arg2[%c1, %c0_12, %c0_13] : memref<3x8x1xi32, #tpu.memory_space<vmem>>, vector<1x8x1xi32>
      %25 = vector.shape_cast %24 : vector<1x8x1xi32> to vector<8x1xi32>
      %c2 = arith.constant 2 : index
      %c0_14 = arith.constant 0 : index
      %c0_15 = arith.constant 0 : index
      %26 = vector.load %arg2[%c2, %c0_14, %c0_15] : memref<3x8x1xi32, #tpu.memory_space<vmem>>, vector<1x8x1xi32>
      %27 = vector.shape_cast %26 : vector<1x8x1xi32> to vector<8x1xi32>
      %c0_16 = arith.constant 0 : index
      %c0_17 = arith.constant 0 : index
      %c0_18 = arith.constant 0 : index
      %28 = vector.load %arg3[%c0_16, %c0_17, %c0_18] : memref<3x1x8xi32, #tpu.memory_space<vmem>>, vector<1x1x8xi32>
      %29 = vector.shape_cast %28 : vector<1x1x8xi32> to vector<1x8xi32>
      %c1_19 = arith.constant 1 : index
      %c0_20 = arith.constant 0 : index
      %c0_21 = arith.constant 0 : index
      %30 = vector.load %arg3[%c1_19, %c0_20, %c0_21] : memref<3x1x8xi32, #tpu.memory_space<vmem>>, vector<1x1x8xi32>
      %31 = vector.shape_cast %30 : vector<1x1x8xi32> to vector<1x8xi32>
      %c2_22 = arith.constant 2 : index
      %c0_23 = arith.constant 0 : index
      %c0_24 = arith.constant 0 : index
      %32 = vector.load %arg3[%c2_22, %c0_23, %c0_24] : memref<3x1x8xi32, #tpu.memory_space<vmem>>, vector<1x1x8xi32>
      %33 = vector.shape_cast %32 : vector<1x1x8xi32> to vector<1x8xi32>
      %34 = vector.broadcast %23 : vector<8x1xi32> to vector<8x8xi32>
      %35 = vector.broadcast %29 : vector<1x8xi32> to vector<8x8xi32>
      %36 = arith.cmpi eq, %34, %35 : vector<8x8xi32>
      %37 = vector.broadcast %25 : vector<8x1xi32> to vector<8x8xi32>
      %38 = vector.broadcast %31 : vector<1x8xi32> to vector<8x8xi32>
      %39 = arith.cmpi ne, %37, %38 : vector<8x8xi32>
      %40 = vector.broadcast %27 : vector<8x1xi32> to vector<8x8xi32>
      %41 = vector.broadcast %33 : vector<1x8xi32> to vector<8x8xi32>
      %42 = arith.cmpi ne, %40, %41 : vector<8x8xi32>
      %43 = tpu.iota {dimensions = array<i32: 0>} : vector<8x8xi32>
      %44 = tpu.iota {dimensions = array<i32: 1>} : vector<8x8xi32>
      %45 = arith.cmpi ne, %43, %44 : vector<8x8xi32>
      %46 = arith.ori %39, %42 : vector<8x8xi1>
      %47 = arith.andi %36, %46 : vector<8x8xi1>
      %48 = arith.andi %47, %45 : vector<8x8xi1>
      %cst_25 = arith.constant dense<true> : vector<8x8xi1>
      %49 = arith.xori %36, %cst_25 : vector<8x8xi1>
      %cst_26 = arith.constant dense<true> : vector<8x8xi1>
      %50 = arith.xori %39, %cst_26 : vector<8x8xi1>
      %51 = arith.andi %36, %50 : vector<8x8xi1>
      %52 = arith.andi %49, %51 : vector<8x8xi1>
      %53 = arith.andi %52, %45 : vector<8x8xi1>
      %54 = arith.extui %48 : vector<8x8xi1> to vector<8x8xi32>
      %55 = arith.sitofp %54 : vector<8x8xi32> to vector<8x8xf32>
      %56 = arith.extui %53 : vector<8x8xi1> to vector<8x8xi32>
      %57 = arith.sitofp %56 : vector<8x8xi32> to vector<8x8xf32>
      %cst_27 = arith.constant dense<0xFF800000> : vector<8xf32>
      %58 = vector.multi_reduction <maximumf>, %15, %cst_27 [1] : vector<8x8xf32> to vector<8xf32>
      %59 = vector.shape_cast %58 : vector<8xf32> to vector<8x1xf32>
      %60 = vector.broadcast %59 : vector<8x1xf32> to vector<8x8xf32>
      %61 = arith.subf %15, %60 : vector<8x8xf32>
      %62 = math.exp %61 : vector<8x8xf32>
      %63 = arith.mulf %62, %55 : vector<8x8xf32>
      %cst_28 = arith.constant dense<0.000000e+00> : vector<8xf32>
      %64 = vector.multi_reduction <add>, %63, %cst_28 [1] : vector<8x8xf32> to vector<8xf32>
      %65 = vector.shape_cast %64 : vector<8xf32> to vector<8x1xf32>
      %66 = arith.mulf %62, %57 : vector<8x8xf32>
      %cst_29 = arith.constant dense<0.000000e+00> : vector<8xf32>
      %67 = vector.multi_reduction <add>, %66, %cst_29 [1] : vector<8x8xf32> to vector<8xf32>
      %68 = vector.shape_cast %67 : vector<8xf32> to vector<8x1xf32>
      %cst_30 = arith.constant dense<0.000000e+00> : vector<8xf32>
      %69 = vector.multi_reduction <add>, %55, %cst_30 [1] : vector<8x8xf32> to vector<8xf32>
      %70 = vector.shape_cast %69 : vector<8xf32> to vector<8x1xf32>
      %cst_31 = arith.constant 9.99999997E-7 : f32
      %71 = vector.broadcast %cst_31 : f32 to vector<8x1xf32>
      %72 = arith.maximumf %70, %71 : vector<8x1xf32>
      %cst_32 = arith.constant dense<0.000000e+00> : vector<8xf32>
      %73 = vector.multi_reduction <add>, %57, %cst_32 [1] : vector<8x8xf32> to vector<8xf32>
      %74 = vector.shape_cast %73 : vector<8xf32> to vector<8x1xf32>
      %cst_33 = arith.constant 9.99999997E-7 : f32
      %75 = vector.broadcast %cst_33 : f32 to vector<8x1xf32>
      %76 = arith.maximumf %74, %75 : vector<8x1xf32>
      %77 = tpu.reciprocal %72 {approx = true} : vector<8x1xf32> -> vector<8x1xf32>
      %78 = arith.mulf %65, %77 : vector<8x1xf32>
      %79 = tpu.reciprocal %76 {approx = true} : vector<8x1xf32> -> vector<8x1xf32>
      %80 = arith.mulf %68, %79 : vector<8x1xf32>
      %81 = tpu.reciprocal %80 {approx = true} : vector<8x1xf32> -> vector<8x1xf32>
      %82 = arith.mulf %78, %81 : vector<8x1xf32>
      %cst_34 = arith.constant 9.99999997E-7 : f32
      %83 = vector.broadcast %cst_34 : f32 to vector<8x1xf32>
      %84 = arith.addf %82, %83 : vector<8x1xf32>
      %85 = math.log %84 : vector<8x1xf32>
      %cst_35 = arith.constant 0.000000e+00 : f32
      %86 = vector.broadcast %cst_35 : f32 to vector<8x1xf32>
      %87 = arith.subf %86, %85 : vector<8x1xf32>
      %cst_36 = arith.constant dense<0.000000e+00> : vector<1xf32>
      %88 = vector.multi_reduction <add>, %87, %cst_36 [0] : vector<8x1xf32> to vector<1xf32>
      %89 = vector.shape_cast %88 : vector<1xf32> to vector<1x1xf32>
      %cst_37 = arith.constant 1.250000e-01 : f32
      %90 = vector.broadcast %cst_37 : f32 to vector<1x1xf32>
      %91 = arith.mulf %89, %90 : vector<1x1xf32>
      %c0_38 = arith.constant 0 : index
      %c0_39 = arith.constant 0 : index
      %92 = vector.load %arg4[%c0_38, %c0_39] : memref<1x1xf32, #tpu.memory_space<vmem>>, vector<1x1xf32>
      tpu.vector_store %arg4[%c0_38, %c0_39], %91 {strides = array<i32>} : memref<1x1xf32, #tpu.memory_space<vmem>>, vector<1x1xf32>,
    } else {
    }
    return
  }
}

</mosaic_0001>

<bundles_post_ra>
// kernel: tpu_custom_call.1
= control target key start
LH: loop header
LB: loop body
LE: loop exit
PB: predicated region body
PF: predicated region fallthrough
CT: control target
= control target key end

     0   :  { %10 = vsyncpa [#allocation4], 0  ;;  %vm22_vm0 = vcmask 261120   ;;  %vm79_vm1 = vcmask 0   ;;  %v255_v3 = vmov 0.0   ;;  %vm256_vm2 = vmmov 0   ;;  %s335_s0 = inlined_call_operand.<no memory space> [shape: s32[1], index: 0, kind: input, shape index: {}]   ;;  %s336_s1 = inlined_call_operand.vmem [shape: f32[8,32], index: 1, kind: input, shape index: {}]   ;;  %s337_s2 = inlined_call_operand.vmem [shape: s32[3,8,1], index: 2, kind: input, shape index: {}]   ;;  %s338_s3 = inlined_call_operand.vmem [shape: s32[3,1,8], index: 3, kind: input, shape index: {}]   ;;  %s339_s4 = inlined_call_operand.hbm [shape: f32[1,1], index: 4, kind: output, shape index: {}]  }
   0x1   :  { %v20_v0 = vld [vmem:[%s336_s1] sm:$0xff]  ;;  %205 = vmatprep.subr.bf16.mxu0 %v255_v3  ;;  %80 = vst.msk [vmem:[#allocation3] sm:$0x1] %vm79_vm1, %v255_v3  ;;  %207 = vmatprep.mubr.msk.bf16.mxu0 %vm256_vm2, %v255_v3  ;;  %p193_p0 = scmp.eq.s32.totalorder %s335_s0, 0 }
   0x2   :  { %v21_v1 = vmul.f32 %v20_v0, %v20_v0  ;;  %vm137_vm3 = vcmask (!%p193_p0), 64512   ;;  %v86_v17 = vld [vmem:[%s337_s2] sm:$0xff] (!%p193_p0)  ;;  %v257_v19 = vmov (!%p193_p0), 0   ;;  %v195_v20 = vld [vmem:[%s337_s2 + $0x10] sm:$0xff] (!%p193_p0)  ;;  %v194_v21 = vld [vmem:[%s337_s2 + $0x8] sm:$0xff] (!%p193_p0)  ;;  %v120_v27 = vlaneseq (!%p193_p0) }
   0x3   :  { %220 = vset.pattern.permute.xlu1 (!%p193_p0), %v257_v19  ;;  %219 = vset.pattern.permute.xlu0 (!%p193_p0), %v257_v19  ;;  %v198_v26 = vld [vmem:[%s338_s3] ss:$0 sm:$0xff] (!%p193_p0)  ;;  %v199_v28 = vld [vmem:[%s338_s3 + $0x1] ss:$0 sm:$0xff] (!%p193_p0)  ;;  %v200_v29 = vld [vmem:[%s338_s3 + $0x2] ss:$0 sm:$0xff] (!%p193_p0) }
   0x4   :  { %v23_v2 = vsel %vm22_vm0, %v21_v1, 0.0  ;;  %97 = vperm.xlu1 (!%p193_p0), %220, %v86_v17   ;;  %v121_v32 = vshrl.u32 (!%p193_p0), %v120_v27, 7  ;;  %v123_v33 = vand.u32 (!%p193_p0), 127, %v120_v27  ;;  %vm258_vm6 = vmmov (!%p193_p0), 1  }
   0x5   :  { %24 = vadd.xlane.f32.xlu0 %v23_v2  ;;  %v259_v35 = vmov (!%p193_p0), 0.0  }
   0x6   :  { %vm124_vm12 = vcmp.ne.s32.totalorder (!%p193_p0), %v121_v32, %v123_v33 }
   0x8   :  { %113 = vperm.xlu1 (!%p193_p0), %220, %v195_v20  }
  0x83   :  { %v98_v23 = vpop.permute.xlu1 (!%p193_p0), %97 }
  0x84   :  { %vm103_vm4 = vcmp.eq.s32.totalorder (!%p193_p0), %v98_v23, %v198_v26 }
  0x85   :  { %vm128_vm7 = vmxor (!%p193_p0), %vm103_vm4, %vm258_vm6 }
  0x87   :  { %v114_v30 = vpop.permute.xlu1 (!%p193_p0), %113 }
  0x88   :  { %vm119_vm8 = vcmp.ne.s32.totalorder (!%p193_p0), %v114_v30, %v200_v29 }
  0x92   :  { %v25_v4 = vpop.xlane.xlu0 %24 }
  0x93   :  { %v26_v5 = vmax.f32 %v25_v4, 1e-24 }
  0x95   :  { %217 = vrsqrt.f32 %v26_v5 }
  0x9f   :  { %v218_v6 = vpop.eup %217 }
  0xa0   :  { %v28_v7 = vmul.f32 %v218_v6, %v20_v0  ;;  %v30_v9 = vmul.f32 16.666666, %v218_v6 }
  0xa2   :  { %v29_v8 = vpack.c.bf16 %v28_v7, %v28_v7  ;;  %v31_v11 = vmul.f32 %v30_v9, %v20_v0 }
  0xa4   :  { %v37_v10 = vsel %vm22_vm0, %v29_v8, 0  ;;  %v32_v12 = vpack.c.bf16 %v31_v11, %v31_v11 }
  0xa5   :  { %206 = vmatpush3.bf16.xpose.msra.mxu0 %v37_v10 }
  0xac   :  { %208 = vmatmul.mubr.msk.bf16.vlgmr.msra.gmra.mrb[0].mxu0 %vm22_vm0, %v32_v12 }
 0x17c   :  { %85 = sbr.rel (%p193_p0) target bundleno = 746 (0x2ea), region = 21 }
 0x17f   :  { %v73_v13 = vpop.f32.mrb[0].mxu0 }
 0x180   :  { %v209_v14 = vpop.f32.mrb[1].mxu0  ;;  %v138_v18 = vsel (!%p193_p0), %vm137_vm3, %v73_v13, -inf }
 0x181   :  { %v76_v15 = vpop.f32.mrb[2].mxu0  ;;  %139 = vmax.xlane.f32.xlu0 (!%p193_p0), %v138_v18 }
 0x182   :  { %v210_v16 = vpop.f32.mrb[3].mxu0 }
 0x197   :  { %105 = vperm.xlu0 %219, %v194_v21  }
 0x20e   :  { %v140_v22 = vpop.xlane.xlu0 %139 }
 0x20f   :  { %v141_v24 = vsub.f32 %v73_v13, %v140_v22 }
 0x211   :  { %v142_v25 = vmul.f32 1.442695, %v141_v24 }
 0x213   :  { %221 = vpow2.f32 %v142_v25 }
 0x216   :  { %v106_v31 = vpop.permute.xlu0 %105 }
 0x217   :  { %vm111_vm5 = vcmp.ne.s32.totalorder %v106_v31, %v199_v28 }
 0x218   :  { %vm129_vm9 = vmxor %vm111_vm5, %vm258_vm6 }
 0x219   :  { %vm130_vm10 = vmand %vm103_vm4, %vm129_vm9 }
 0x21a   :  { %vm125_vm11 = vmor %vm111_vm5, %vm119_vm8 }
 0x21b   :  { %vm126_vm13 = vmand %vm103_vm4, %vm125_vm11 }
 0x21c   :  { %vm131_vm14 = vmand %vm128_vm7, %vm130_vm10 }
 0x21d   :  { %v222_v34 = vpop.eup %221  ;;  %vm132_vm15 = vmand %vm131_vm14, %vm124_vm12 }
 0x21e   :  { %v202_v36 = vsel %vm132_vm15, 1.0, %v259_v35  ;;  %vm127_vm0 = vmand %vm126_vm13, %vm124_vm12 }
 0x21f   :  { %v156_v37 = vsel %vm137_vm3, %v202_v36, 0.0  ;;  %v148_v38 = vmul.f32 %v222_v34, %v202_v36  ;;  %v201_v39 = vsel %vm127_vm0, 1.0, %v259_v35 }
 0x220   :  { %157 = vadd.xlane.f32.xlu1 %v156_v37  ;;  %v152_v41 = vsel %vm137_vm3, %v201_v39, 0.0  ;;  %v144_v42 = vmul.f32 %v222_v34, %v201_v39 }
 0x221   :  { %v149_v40 = vsel %vm137_vm3, %v148_v38, 0.0 }
 0x222   :  { %150 = vadd.xlane.f32.xlu0 %v149_v40  ;;  %v145_v43 = vsel %vm137_vm3, %v144_v42, 0.0 }
 0x224   :  { %153 = vadd.xlane.f32.xlu1 %v152_v41 }
 0x228   :  { %146 = vadd.xlane.f32.xlu1 %v145_v43 }
 0x2ad   :  { %v158_v44 = vpop.xlane.xlu1 %157 }
 0x2ae   :  { %v159_v45 = vmax.f32 %v158_v44, 1e-06 }
 0x2af   :  { %v151_v49 = vpop.xlane.xlu0 %150 }
 0x2b0   :  { %223 = vrcp.f32 %v159_v45 }
 0x2b1   :  { %v154_v46 = vpop.xlane.xlu1 %153 }
 0x2b2   :  { %v155_v47 = vmax.f32 %v154_v46, 1e-06 }
 0x2b4   :  { %225 = vrcp.f32 %v155_v47 }
 0x2b5   :  { %v147_v52 = vpop.xlane.xlu1 %146 }
 0x2ba   :  { %v224_v48 = vpop.eup %223 }
 0x2bb   :  { %v163_v50 = vmul.f32 %v224_v48, %v151_v49 }
 0x2bd   :  { %227 = vrcp.f32 %v163_v50 }
 0x2be   :  { %v226_v51 = vpop.eup %225 }
 0x2bf   :  { %v161_v53 = vmul.f32 %v226_v51, %v147_v52 }
 0x2c7   :  { %v228_v54 = vpop.eup %227 }
 0x2c8   :  { %v165_v55 = vmul.f32 %v228_v54, %v161_v53 }
 0x2ca   :  { %v166_v56 = vadd.f32 1e-06, %v165_v55 }
 0x2cc   :  { %229 = vlog2.f32 %v166_v56 }
 0x2d6   :  { %v230_v57 = vpop.eup %229 }
 0x2d7   :  { %v168_v58 = vmul.f32 0.6931472, %v230_v57 }
 0x2d9   :  { %v169_v59 = vsub.f32 0.0, %v168_v58 }
 0x2db   :  { %v170_v60 = vrot.slane %v169_v59, 4 }
 0x2dd   :  { %v171_v61 = vadd.f32 %v170_v60, %v169_v59 }
 0x2df   :  { %v172_v62 = vrot.slane %v171_v61, 2 }
 0x2e1   :  { %v173_v63 = vadd.f32 %v172_v62, %v171_v61 }
 0x2e3   :  { %v174_v0 = vrot.slane %v173_v63, 1 }
 0x2e5   :  { %v175_v1 = vadd.f32 %v174_v0, %v173_v63 }
 0x2e7   :  { %v176_v2 = vmul.f32 0.125, %v175_v1 }
 0x2e9   :  { %177 = vst.msk [vmem:[#allocation3] sm:$0x1] %vm79_vm1, %v176_v2 }
 0x2ea PF:  { %s260_s2 = smov [#allocation3]  }
 0x2eb   :  { %s184_s3 = sshll.u32 %s260_s2, 4  ;;  %s185_s3 = int_to_ptr.vmem [resolvable:$true] %s184_s3 }
 0x2ec   :  { %s231_s29 = scalar_lea.vmem %s185_s3, 16  ;;  %s235_s30 = scalar_lea.vmem %s185_s3, 32 }
 0x2ed   :  { %p232_p1 = scmp.ne.s32.totalorder %s185_s3, %s231_s29  ;;  %p236_p2 = scmp.lt.s32.totalorder %s185_s3, %s185_s3 }
 0x2ee   :  { %p237_p3 = scmp.lt.s32.totalorder %s235_s30, %s231_s29 }
 0x2f0   :  { %p238_p4 = por %p237_p3, %p236_p2 }
 0x2f2   :  { %p239_p5 = pnand %p238_p4, %p232_p1 }
 0x2f4   :  { %242 = shalt.err (!%p239_p5)
}
 0x2f5   :  { %s243_s7 = scalar_lea.hbm %s339_s4, 16 }
 0x2f6   :  { %p244_p6 = scmp.ne.s32.totalorder %s339_s4, %s243_s7  ;;  %p247_p7 = scmp.lt.u32.totalorder %s243_s7, %s339_s4 }
 0x2f8   :  { %p249_p8 = pnand %p247_p7, %p244_p6 }
 0x2fa   :  { %252 = shalt.err (!%p249_p8)
}
 0x2fb   :  { %187 = dma.vmem_to_hbm [thread:$0]  %s185_s3, 16, %s339_s4, [#allocation4]  }
 0x2fc   :  { %253 = dma.done.wait [#allocation4], 16  }
 0x2fd   :  { %254 = vsyncadd [#allocation4], 4294967280 }
 0x2fe   :  { %191 = vsyncpa [#allocation4], 1 }

</bundles_post_ra>
